<compile_context>
chip_gen: v6e
topology: v6e:2x2x1
jax: 0.10.0
libtpu: 0.0.40
codegen_flags: <defaults>
</compile_context>

<pallas_src>
from collections import defaultdict

import jax
import jax.numpy as jnp
from jax import lax
from jax.experimental import pallas as pl
from jax.experimental.pallas import tpu as pltpu

# ----------------------------------------------------------------------------
# Scalar-term bookkeeping
# ----------------------------------------------------------------------------
TERM_IDX = {
    'edge1': 0, 'edge2': 1, 'edge3': 2, 'kl_t1': 3,
    'mse_adv': 4, 'mse_b': 5, 'mse_ab': 6,
    'ce_b': 7, 'ce_a': 8, 'ce_t': 9,
}
NUM_OUT = 16

MODE_TERMS = {
    'alp':       ('mse_ab', 'ce_b', 'ce_a'),
    'alpkdce1':  ('edge2', 'ce_t', 'ce_a'),
    'alpkdce':   ('edge2', 'ce_b', 'ce_a'),
    'kl_2':      ('edge2',),
    'kl_1_2':    ('edge1', 'edge2'),
    'kl_1_3':    ('edge1', 'edge3'),
    'kl_2_3b':   ('mse_b', 'edge3'),
    'kl_2_3a':   ('mse_adv', 'edge3'),
    'kl_1_2_3':  ('edge1', 'edge2', 'edge3'),
    'trades':    ('ce_b', 'kl_t1'),
}

TERM_TENSORS = {
    'edge1':   ('benign', 'teacher'),
    'edge2':   ('adversarial', 'teacher'),
    'edge3':   ('adversarial', 'benign'),
    'kl_t1':   ('adversarial', 'benign'),
    'mse_adv': ('adversarial', 'teacher'),
    'mse_b':   ('benign', 'teacher'),
    'mse_ab':  ('adversarial', 'benign'),
    'ce_b':    ('benign',),
    'ce_a':    ('adversarial',),
    'ce_t':    ('teacher',),
}
CE_TERMS = frozenset({'ce_b', 'ce_a', 'ce_t'})

# KL edges: (source, target, use 1/T scaling)
KL_EDGES = {
    'edge1': ('benign', 'teacher', True),
    'edge2': ('adversarial', 'teacher', True),
    'edge3': ('adversarial', 'benign', True),
    'kl_t1': ('adversarial', 'benign', False),
}
CE_TENSOR = {'ce_b': 'benign', 'ce_a': 'adversarial', 'ce_t': 'teacher'}
MSE_PAIR = {'mse_adv': ('adversarial', 'teacher'),
            'mse_b': ('benign', 'teacher'),
            'mse_ab': ('adversarial', 'benign')}


def _round_up(x, m):
    return ((x + m - 1) // m) * m


def _final_scale(term, batch, num_classes, temperature):
    """Final normalization, applied once on the last grid step (per core)."""
    if term in ('edge1', 'edge2', 'edge3'):
        return (temperature * temperature) / batch      # batchmean * T^2
    if term == 'kl_t1':
        return 1.0 / batch                               # batchmean, T = 1
    if term in ('mse_adv', 'mse_b', 'mse_ab'):
        return 1.0 / (batch * num_classes)               # MSE 'mean'
    return 1.0 / batch                                    # cross-entropy 'mean'


# ----------------------------------------------------------------------------
# Hardware queries (generation-aware, with safe fallbacks)
# ----------------------------------------------------------------------------
def _vmem_capacity_bytes():
    try:
        info = pltpu.get_tpu_info()
        cap = getattr(info, 'vmem_capacity_bytes', None)
        if cap:
            return int(cap)
    except Exception:
        pass
    return 64 << 20      # conservative fallback (safe on every generation)


def _num_tensorcores():
    try:
        info = pltpu.get_tpu_info()
        for attr in ('num_cores', 'num_tensorcores', 'tensorcore_count',
                     'num_cores_per_chip', 'core_count'):
            v = getattr(info, attr, None)
            if v is not None:
                v = int(v)
                if v >= 1:
                    return v
    except Exception:
        pass
    return 1             # correct on any chip; pass core_split=2 on v7x


# ----------------------------------------------------------------------------
# VMEM budgeting
# ----------------------------------------------------------------------------
def _count_f32_tiles(terms, tensor_names, needs_targets):
    """Live f32 (TB, C) intermediates: upcast inputs, lsm/p caches, onehot."""
    lsm_keys, p_keys = set(), set()
    for t in terms:
        if t in KL_EDGES:
            s, tt, sc = KL_EDGES[t]
            lsm_keys.add((s, sc))
            lsm_keys.add((tt, sc))
            p_keys.add((tt, sc))
    return (len(tensor_names) + len(lsm_keys) + len(p_keys)
            + (1 if needs_targets else 0) + 2)          # +2 transient headroom


def _per_row_bytes(num_classes, n_streams, in_itemsize, n_f32_tiles,
                   n_terms, needs_targets):
    return (n_streams * 2 * num_classes * in_itemsize    # double-buffered inputs
            + n_f32_tiles * num_classes * 4               # live f32 intermediates
            + n_terms * 128 * 4                           # (TB,1) VMEM accumulators
            + (2 * 128 * 4 if needs_targets else 0))      # (TB,1) int32 targets x2


def _choose_block_rows(batch, num_classes, n_streams, in_itemsize, n_f32_tiles,
                       n_terms, needs_targets, core_split, vmem_budget):
    per_row = max(1, _per_row_bytes(num_classes, n_streams, in_itemsize,
                                    n_f32_tiles, n_terms, needs_targets))
    tb = vmem_budget // per_row
    tb = (tb // 8) * 8
    tb = max(8, min(tb, 4096))
    per_core_rows = -(-batch // core_split)
    return min(tb, _round_up(max(1, per_core_rows), 8))


# ----------------------------------------------------------------------------
# Kernel factory (specialized on mode / term set / tensor set)
# ----------------------------------------------------------------------------
def _make_kernel(terms, tensor_names, needs_targets, *, temperature, batch,
                 batch_pad, tile_rows, num_classes, steps_per_core,
                 use_mxu_lane_sums=False):
    T = float(temperature)
    inv_T = 1.0 / T
    n_tensors = len(tensor_names)
    n_terms = len(terms)

    def kernel(*refs):
        t_refs = dict(zip(tensor_names, refs[:n_tensors]))
        pos = n_tensors
        tgt_ref = None
        if needs_targets:
            tgt_ref = refs[pos]
            pos += 1
        out_ref = refs[pos]
        pos += 1
        acc_refs = refs[pos:pos + n_terms]

        step = pl.program_id(1)
        last = steps_per_core - 1

        # --- init resident VMEM accumulators (first step of this core) ------
        @pl.when(step == 0)
        def _init():
            out_ref[...] = jnp.zeros_like(out_ref)
            for acc in acc_refs:
                acc[...] = jnp.zeros_like(acc)

        # --- load & upcast the needed tiles exactly once ---------------------
        x = {name: t_refs[name][...].astype(jnp.float32)
             for name in tensor_names}

        # lane-sum helper (optionally routed through the otherwise-idle MXU)
        if use_mxu_lane_sums:
            ones_col = jnp.ones((num_classes, 1), jnp.float32)

            def lane_sum(v):
                return jnp.dot(v, ones_col, preferred_element_type=jnp.float32)
        else:
            def lane_sum(v):
                return jnp.sum(v, axis=1, keepdims=True)

        # --- row-validity mask (only if the batch was padded) ----------------
        if batch_pad != batch:
            gstep = pl.program_id(0) * steps_per_core + step
            row_ids = gstep * tile_rows + lax.broadcasted_iota(
                jnp.int32, (tile_rows, 1), 0)
            valid = (row_ids < batch).astype(jnp.float32)
        else:
            valid = None

        # --- shared softmax statistics / intermediates -----------------------
        stat_cache, lsm_cache, p_cache, ent_cache = {}, {}, {}, {}

        def z_of(name, scaled):
            return x[name] * inv_T if scaled else x[name]

        def get_stats(name, scaled):                 # (row max, log-sum-exp)
            key = (name, scaled)
            if key not in stat_cache:
                z = z_of(name, scaled)
                m = jnp.max(z, axis=1, keepdims=True)
                se = lane_sum(jnp.exp(z - m))
                stat_cache[key] = (m, jnp.log(se))
            return stat_cache[key]

        def get_lsm(name, scaled):
            key = (name, scaled)
            if key not in lsm_cache:
                m, lse = get_stats(name, scaled)
                lsm_cache[key] = z_of(name, scaled) - (m + lse)
            return lsm_cache[key]

        def get_p(name, scaled):
            key = (name, scaled)
            if key not in p_cache:
                p_cache[key] = jnp.exp(get_lsm(name, scaled))
            return p_cache[key]

        def tgt_entropy(name, scaled):               # sum_c p * log p, per row
            key = (name, scaled)
            if key not in ent_cache:
                ent_cache[key] = lane_sum(get_p(name, scaled) *
                                          get_lsm(name, scaled))
            return ent_cache[key]

        onehot = None
        if needs_targets:
            tgt = tgt_ref[...]                                    # (TB, 1) int32
            lane = lax.broadcasted_iota(jnp.int32, (tile_rows, num_classes), 1)
            onehot = (lane == tgt).astype(jnp.float32)            # (TB, C)

        # --- per-row (lane-reduced) contributions of each term ---------------
        def kld_rows(s_name, t_name, scaled):
            # sum_c p_t*(lsm_t - lsm_s) = cached target entropy - sum p_t*lsm_s
            return tgt_entropy(t_name, scaled) - lane_sum(
                get_p(t_name, scaled) * get_lsm(s_name, scaled))

        def ce_rows(name):
            # LSE form: (m + log sum exp(z-m)) - z[target]; no full lsm tile.
            m, lse = get_stats(name, False)
            return (m + lse) - lane_sum(onehot * x[name])

        def mse_rows(a_name, b_name):
            d = x[a_name] - x[b_name]
            return lane_sum(d * d)

        def rows_of(term):
            if term in KL_EDGES:
                return kld_rows(*KL_EDGES[term])
            if term in CE_TENSOR:
                return ce_rows(CE_TENSOR[term])
            return mse_rows(*MSE_PAIR[term])

        # --- accumulate per-row columns into resident VMEM accumulators ------
        for j, term in enumerate(terms):
            col = rows_of(term)
            if valid is not None:
                col = col * valid
            acc_refs[j][...] = acc_refs[j][...] + col

        # --- finalize: collapse + normalize once per core --------------------
        @pl.when(step == last)
        def _finalize():
            sub = lax.broadcasted_iota(jnp.int32, (8, 128), 0)
            lane = lax.broadcasted_iota(jnp.int32, (8, 128), 1)
            tile = jnp.zeros((8, 128), jnp.float32)
            for j, term in enumerate(terms):
                scale = jnp.float32(_final_scale(term, batch, num_classes, T))
                val = jnp.sum(acc_refs[j][...]) * scale
                tile = jnp.where((sub == 0) & (lane == TERM_IDX[term]),
                                 val, tile)
            out_ref[...] = tile

    return kernel


# ----------------------------------------------------------------------------
# Wrapper: mode-specialized pallas_call
# ----------------------------------------------------------------------------
def compute_loss_terms(benign, adversarial, teacher, targets, temperature,
                       training_loss, *, block_rows=None, core_split=None,
                       use_mxu_lane_sums=False):
    """Runs the Pallas kernel; returns a (NUM_OUT,) f32 vector of scalar terms.

    Only the terms required by `training_loss` are computed; unused slots stay
    zero.  Only the logit tensors those terms touch are streamed in.
    """
    if training_loss not in MODE_TERMS:
        raise ValueError(f"unknown training_loss {training_loss!r}")
    terms = MODE_TERMS[training_loss]

    tensor_order = ('benign', 'adversarial', 'teacher')
    needed = set()
    for t in terms:
        needed.update(TERM_TENSORS[t])
    tensor_names = tuple(n for n in tensor_order if n in needed)
    needs_targets = any(t in CE_TERMS for t in terms)

    arrays = {'benign': benign, 'adversarial': adversarial, 'teacher': teacher}
    B, C = benign.shape
    in_itemsize = max(jnp.dtype(arrays[n].dtype).itemsize for n in tensor_names)

    vmem_cap = _vmem_capacity_bytes()
    if core_split is None:
        core_split = _num_tensorcores()
    core_split = max(1, int(core_split))

    n_f32 = _count_f32_tiles(terms, tensor_names, needs_targets)

    if block_rows is None:
        TB = _choose_block_rows(B, C, len(tensor_names), in_itemsize, n_f32,
                                len(terms), needs_targets, core_split,
                                vmem_budget=vmem_cap // 2)
    else:
        TB = max(8, (int(block_rows) // 8) * 8)
        TB = min(TB, _round_up(max(1, -(-B // core_split)), 8))

    B_pad = _round_up(B, TB * core_split)
    steps_per_core = B_pad // (TB * core_split)
    grid = (core_split, steps_per_core)

    def pad_rows(x):
        if x.shape[0] == B_pad:
            return x
        return jnp.pad(x, ((0, B_pad - x.shape[0]), (0, 0)))

    inputs, in_specs = [], []
    for name in tensor_names:
        inputs.append(pad_rows(arrays[name]))
        in_specs.append(pl.BlockSpec(
            (TB, C), lambda c, i: (c * steps_per_core + i, 0)))
    if needs_targets:
        tgt = targets.astype(jnp.int32).reshape(B, 1)
        inputs.append(pad_rows(tgt))
        in_specs.append(pl.BlockSpec(
            (TB, 1), lambda c, i: (c * steps_per_core + i, 0)))

    kernel = _make_kernel(
        terms, tensor_names, needs_targets,
        temperature=float(temperature), batch=B, batch_pad=B_pad,
        tile_rows=TB, num_classes=C, steps_per_core=steps_per_core,
        use_mxu_lane_sums=use_mxu_lane_sums)

    # VMEM limit: double-buffered inputs + f32 intermediates + accumulators.
    resident_bytes = (len(tensor_names) * 2 * TB * C * in_itemsize
                      + n_f32 * TB * C * 4
                      + len(terms) * TB * 128 * 4
                      + (2 * TB * 128 * 4 if needs_targets else 0)
                      + 2 * 8 * 128 * 4)
    vmem_limit = int(min(max(vmem_cap - (4 << 20), 16 << 20),
                         max(resident_bytes + (16 << 20), 32 << 20)))

    # Output: one (8,128) f32 VMEM tile per core; term values live in row 0.
    out = pl.pallas_call(
        kernel,
        out_shape=jax.ShapeDtypeStruct((core_split * 8, 128), jnp.float32),
        grid_spec=pltpu.PrefetchScalarGridSpec(
            num_scalar_prefetch=0,
            grid=grid,
            in_specs=in_specs,
            out_specs=pl.BlockSpec((8, 128), lambda c, i: (c, 0)),
            scratch_shapes=[pltpu.VMEM((TB, 1), jnp.float32)
                            for _ in terms],
        ),
        compiler_params=pltpu.CompilerParams(
            dimension_semantics=("parallel", "arbitrary"),
            vmem_limit_bytes=vmem_limit,
        ),
    )(*inputs)

    partials = out.reshape(core_split, 8, 128)
    return partials[:, 0, :NUM_OUT].sum(axis=0)


# ----------------------------------------------------------------------------
# Module-equivalent wrapper
# ----------------------------------------------------------------------------
class LossCalculator:
    """JAX/Pallas port of the PyTorch LossCalulcator forward pass."""

    def __init__(self, temperature, distillation_weight, epoch, training_loss,
                 kernel_kwargs=None):
        self.temperature = float(temperature)
        self.distillation_weight = float(distillation_weight)
        self.epoch = epoch
        self.training_loss = training_loss
        self.loss_log = defaultdict(list)
        self.kernel_kwargs = dict(kernel_kwargs or {})

    def __call__(self, benign, targets, adversarial, teacher):
        terms = compute_loss_terms(benign, adversarial, teacher, targets,
                                   self.temperature, self.training_loss,
                                   **self.kernel_kwargs)
        g = lambda name: terms[TERM_IDX[name]]
        w = self.distillation_weight

        soft_target_loss = jnp.float32(0.0)
        hard_target_loss = jnp.float32(0.0)

        if self.training_loss == 'alp':
            soft_target_loss = g('mse_ab')
            hard_target_loss = 0.5 * (g('ce_b') + g('ce_a'))
            total_loss = hard_target_loss + soft_target_loss * w
        elif self.training_loss == 'alpkdce1':
            soft_target_loss = g('edge2')
            hard_target_loss = 0.5 * (g('ce_t') + g('ce_a'))
            total_loss = hard_target_loss * (1 - w) + soft_target_loss * w
        elif self.training_loss == 'alpkdce':
            soft_target_loss = g('edge2')
            hard_target_loss = 0.5 * (g('ce_b') + g('ce_a'))
            total_loss = hard_target_loss * (1 - w) + soft_target_loss * w
        elif self.training_loss == 'kl_2':
            total_loss = g('edge2')
        elif self.training_loss == 'kl_1_2':
            total_loss = 0.5 * (g('edge1') + g('edge2'))
        elif self.training_loss == 'kl_1_3':
            total_loss = (1 - w) * g('edge1') + w * g('edge3')
        elif self.training_loss == 'kl_2_3b':
            total_loss = (1 - w) * g('mse_b') + w * g('edge3')
        elif self.training_loss == 'kl_2_3a':
            total_loss = (1 - w) * g('mse_adv') + w * g('edge3')
        elif self.training_loss == 'kl_1_2_3':
            total_loss = (1 - w) * 0.5 * (g('edge1') + g('edge2')) + w * g('edge3')
        elif self.training_loss == 'trades':
            hard_target_loss = g('ce_b')
            soft_target_loss = g('kl_t1')
            total_loss = hard_target_loss + 5.0 * soft_target_loss
        else:
            raise ValueError(f"unknown training_loss {self.training_loss!r}")

        self.loss_log['hard_target_loss'].append(hard_target_loss)
        self.loss_log['soft_target_loss'].append(soft_target_loss)
        self.loss_log['total_loss'].append(total_loss)
        return total_loss

    def get_log(self, length=100):
        log = []
        for key in self.loss_log.keys():
            if len(self.loss_log[key]) < length:
                length = len(self.loss_log[key])
            vals = [float(v) for v in self.loss_log[key][-length:]]
            log.append('%2.3f' % (sum(vals) / length))
        return ', '.join(log)


# ----------------------------------------------------------------------------
# Pure-JAX reference (mirrors the PyTorch forward exactly)
# ----------------------------------------------------------------------------
def _ref_total_loss(mode, benign, targets, adversarial, teacher, T, w):
    benign = benign.astype(jnp.float32)
    adversarial = adversarial.astype(jnp.float32)
    teacher = teacher.astype(jnp.float32)

    def kld(s_logits, t_logits):
        lp_s = jax.nn.log_softmax(s_logits, axis=1)
        lp_t = jax.nn.log_softmax(t_logits, axis=1)
        return jnp.sum(jnp.exp(lp_t) * (lp_t - lp_s)) / s_logits.shape[0]

    def ce(logits):
        lsm = jax.nn.log_softmax(logits, axis=1)
        return -jnp.mean(lsm[jnp.arange(logits.shape[0]), targets])

    mse = lambda x, y: jnp.mean((x - y) ** 2)

    edge1 = kld(benign / T, teacher / T) * T * T
    edge2 = kld(adversarial / T, teacher / T) * T * T
    edge3 = kld(adversarial / T, benign / T) * T * T

    if mode == 'alp':
        return 0.5 * (ce(benign) + ce(adversarial)) + w * mse(adversarial, benign)
    if mode == 'alpkdce1':
        return 0.5 * (ce(teacher) + ce(adversarial)) * (1 - w) + w * edge2
    if mode == 'alpkdce':
        return 0.5 * (ce(benign) + ce(adversarial)) * (1 - w) + w * edge2
    if mode == 'kl_2':
        return edge2
    if mode == 'kl_1_2':
        return 0.5 * (edge1 + edge2)
    if mode == 'kl_1_3':
        return (1 - w) * edge1 + w * edge3
    if mode == 'kl_2_3b':
        return (1 - w) * mse(benign, teacher) + w * edge3
    if mode == 'kl_2_3a':
        return (1 - w) * mse(adversarial, teacher) + w * edge3
    if mode == 'kl_1_2_3':
        return (1 - w) * 0.5 * (edge1 + edge2) + w * edge3
    if mode == 'trades':
        return ce(benign) + 5.0 * kld(adversarial, benign)
    raise ValueError(mode)


if __name__ == "__main__":
    key = jax.random.PRNGKey(0)
    kb, ka, kt, ky = jax.random.split(key, 4)

    T_VAL, W_VAL = 4.0, 0.3

    # --- small, lane-aligned test case: 8 rows of 128-class logits ----------
    B, C = 8, 128
    benign = jax.random.normal(kb, (B, C), dtype=jnp.float32)
    adversarial = benign + 0.1 * jax.random.normal(ka, (B, C), dtype=jnp.float32)
    teacher = jax.random.normal(kt, (B, C), dtype=jnp.float32)
    targets = jax.random.randint(ky, (B,), 0, C, dtype=jnp.int32)

    for mode in MODE_TERMS:
        calc = LossCalculator(T_VAL, W_VAL, 0, mode)
        got = jax.block_until_ready(calc(benign, targets, adversarial, teacher))
        ref = _ref_total_loss(mode, benign, targets, adversarial, teacher,
                              T_VAL, W_VAL)
        assert jnp.allclose(got, ref, rtol=1e-3, atol=1e-5), (
            f"mode={mode}: got {float(got)}, ref {float(ref)}")

    # --- multi-tile grid + padded tail (B not a multiple of the tile) -------
    B2 = 20
    kb2, ka2, kt2, ky2 = jax.random.split(jax.random.PRNGKey(1), 4)
    b2 = jax.random.normal(kb2, (B2, C), dtype=jnp.float32)
    a2 = b2 + 0.1 * jax.random.normal(ka2, (B2, C), dtype=jnp.float32)
    t2 = jax.random.normal(kt2, (B2, C), dtype=jnp.float32)
    y2 = jax.random.randint(ky2, (B2,), 0, C, dtype=jnp.int32)
    for mode in ('alpkdce', 'trades', 'kl_1_2_3'):
        calc = LossCalculator(T_VAL, W_VAL, 0, mode,
                              kernel_kwargs={'block_rows': 8})
        got = jax.block_until_ready(calc(b2, y2, a2, t2))
        ref = _ref_total_loss(mode, b2, y2, a2, t2, T_VAL, W_VAL)
        assert jnp.allclose(got, ref, rtol=1e-3, atol=1e-5), (
            f"multi-tile mode={mode}: got {float(got)}, ref {float(ref)}")

    # --- explicit 2-way core split (exercises the per-core partial path) ----
    for mode in ('kl_1_2_3', 'alpkdce'):
        calc = LossCalculator(T_VAL, W_VAL, 0, mode,
                              kernel_kwargs={'block_rows': 8, 'core_split': 2})
        got = jax.block_until_ready(calc(b2, y2, a2, t2))
        ref = _ref_total_loss(mode, b2, y2, a2, t2, T_VAL, W_VAL)
        assert jnp.allclose(got, ref, rtol=1e-3, atol=1e-5), (
            f"core-split mode={mode}: got {float(got)}, ref {float(ref)}")

    # --- bf16 logits (half the HBM traffic), f32 math in-kernel -------------
    b16 = b2[:16].astype(jnp.bfloat16)
    a16 = a2[:16].astype(jnp.bfloat16)
    t16 = t2[:16].astype(jnp.bfloat16)
    y16 = y2[:16]
    calc = LossCalculator(T_VAL, W_VAL, 0, 'kl_1_2_3')
    got = jax.block_until_ready(calc(b16, y16, a16, t16))
    ref = _ref_total_loss('kl_1_2_3', b16, y16, a16, t16, T_VAL, W_VAL)
    assert jnp.allclose(got, ref, rtol=1e-3, atol=1e-5), (
        f"bf16: got {float(got)}, ref {float(ref)}")

    print("KERNEL_OK")
</pallas_src>

<mosaic_0001>
module attributes {stable_mosaic.version = 11 : i64} {
  func.func @kernel(%arg0: i32, %arg1: i32, %arg2: memref<8x128xf32, #tpu.memory_space<vmem>>, %arg3: memref<8x128xf32, #tpu.memory_space<vmem>>, %arg4: memref<8x1xi32, #tpu.memory_space<vmem>>, %arg5: memref<8x128xf32, #tpu.memory_space<vmem>>, %arg6: memref<8x1xf32, #tpu.memory_space<vmem>>, %arg7: memref<8x1xf32, #tpu.memory_space<vmem>>, %arg8: memref<8x1xf32, #tpu.memory_space<vmem>>) attributes {dimension_semantics = [#tpu.dimension_semantics<parallel>, #tpu.dimension_semantics<arbitrary>], iteration_bounds = array<i64: 1, 1>, scalar_prefetch = 0 : i64, scratch_operands = 3 : i64, tpu.core_type = #tpu.core_type<tc>, window_params = [{transform_indices = @transform_0, window_bounds = array<i64: 8, 128>}, {transform_indices = @transform_1, window_bounds = array<i64: 8, 128>}, {transform_indices = @transform_2, window_bounds = array<i64: 8, 1>}, {transform_indices = @transform_3, window_bounds = array<i64: 8, 128>}]} {
    %c0_i32 = arith.constant 0 : i32
    %0 = arith.cmpi eq, %arg1, %c0_i32 : i32
    %1 = arith.extui %0 : i1 to i32
    %c0_i32_0 = arith.constant 0 : i32
    %2 = arith.cmpi ne, %1, %c0_i32_0 : i32
    scf.if %2 {
      %cst_26 = arith.constant 0.000000e+00 : f32
      %53 = vector.broadcast %cst_26 : f32 to vector<8x128xf32>
      %c0_27 = arith.constant 0 : index
      %c0_28 = arith.constant 0 : index
      %54 = vector.load %arg5[%c0_27, %c0_28] : memref<8x128xf32, #tpu.memory_space<vmem>>, vector<8x128xf32>
      tpu.vector_store %arg5[%c0_27, %c0_28], %53 {strides = array<i32>} : memref<8x128xf32, #tpu.memory_space<vmem>>, vector<8x128xf32>,
      %cst_29 = arith.constant 0.000000e+00 : f32
      %55 = vector.broadcast %cst_29 : f32 to vector<8x1xf32>
      %c0_30 = arith.constant 0 : index
      %c0_31 = arith.constant 0 : index
      %56 = vector.load %arg6[%c0_30, %c0_31] : memref<8x1xf32, #tpu.memory_space<vmem>>, vector<8x1xf32>
      tpu.vector_store %arg6[%c0_30, %c0_31], %55 {strides = array<i32>} : memref<8x1xf32, #tpu.memory_space<vmem>>, vector<8x1xf32>,
      %cst_32 = arith.constant 0.000000e+00 : f32
      %57 = vector.broadcast %cst_32 : f32 to vector<8x1xf32>
      %c0_33 = arith.constant 0 : index
      %c0_34 = arith.constant 0 : index
      %58 = vector.load %arg7[%c0_33, %c0_34] : memref<8x1xf32, #tpu.memory_space<vmem>>, vector<8x1xf32>
      tpu.vector_store %arg7[%c0_33, %c0_34], %57 {strides = array<i32>} : memref<8x1xf32, #tpu.memory_space<vmem>>, vector<8x1xf32>,
      %cst_35 = arith.constant 0.000000e+00 : f32
      %59 = vector.broadcast %cst_35 : f32 to vector<8x1xf32>
      %c0_36 = arith.constant 0 : index
      %c0_37 = arith.constant 0 : index
      %60 = vector.load %arg8[%c0_36, %c0_37] : memref<8x1xf32, #tpu.memory_space<vmem>>, vector<8x1xf32>
      tpu.vector_store %arg8[%c0_36, %c0_37], %59 {strides = array<i32>} : memref<8x1xf32, #tpu.memory_space<vmem>>, vector<8x1xf32>,
    } else {
    }
    %c0 = arith.constant 0 : index
    %c0_1 = arith.constant 0 : index
    %3 = vector.load %arg2[%c0, %c0_1] : memref<8x128xf32, #tpu.memory_space<vmem>>, vector<8x128xf32>
    %c0_2 = arith.constant 0 : index
    %c0_3 = arith.constant 0 : index
    %4 = vector.load %arg3[%c0_2, %c0_3] : memref<8x128xf32, #tpu.memory_space<vmem>>, vector<8x128xf32>
    %c0_4 = arith.constant 0 : index
    %c0_5 = arith.constant 0 : index
    %5 = vector.load %arg4[%c0_4, %c0_5] : memref<8x1xi32, #tpu.memory_space<vmem>>, vector<8x1xi32>
    %6 = tpu.iota {dimensions = array<i32: 1>} : vector<8x128xi32>
    %7 = vector.broadcast %5 : vector<8x1xi32> to vector<8x128xi32>
    %8 = arith.cmpi eq, %6, %7 : vector<8x128xi32>
    %9 = arith.extui %8 : vector<8x128xi1> to vector<8x128xi32>
    %10 = arith.sitofp %9 : vector<8x128xi32> to vector<8x128xf32>
    %11 = arith.subf %4, %3 : vector<8x128xf32>
    %12 = arith.mulf %11, %11 : vector<8x128xf32>
    %cst = arith.constant dense<0.000000e+00> : vector<8xf32>
    %13 = vector.multi_reduction <add>, %12, %cst [1] : vector<8x128xf32> to vector<8xf32>
    %14 = vector.shape_cast %13 : vector<8xf32> to vector<8x1xf32>
    %c0_6 = arith.constant 0 : index
    %c0_7 = arith.constant 0 : index
    %15 = vector.load %arg6[%c0_6, %c0_7] : memref<8x1xf32, #tpu.memory_space<vmem>>, vector<8x1xf32>
    %16 = arith.addf %15, %14 : vector<8x1xf32>
    %c0_8 = arith.constant 0 : index
    %c0_9 = arith.constant 0 : index
    %17 = vector.load %arg6[%c0_8, %c0_9] : memref<8x1xf32, #tpu.memory_space<vmem>>, vector<8x1xf32>
    tpu.vector_store %arg6[%c0_8, %c0_9], %16 {strides = array<i32>} : memref<8x1xf32, #tpu.memory_space<vmem>>, vector<8x1xf32>,
    %cst_10 = arith.constant dense<0xFF800000> : vector<8xf32>
    %18 = vector.multi_reduction <maximumf>, %3, %cst_10 [1] : vector<8x128xf32> to vector<8xf32>
    %19 = vector.shape_cast %18 : vector<8xf32> to vector<8x1xf32>
    %20 = vector.broadcast %19 : vector<8x1xf32> to vector<8x128xf32>
    %21 = arith.subf %3, %20 : vector<8x128xf32>
    %22 = math.exp %21 : vector<8x128xf32>
    %cst_11 = arith.constant dense<0.000000e+00> : vector<8xf32>
    %23 = vector.multi_reduction <add>, %22, %cst_11 [1] : vector<8x128xf32> to vector<8xf32>
    %24 = vector.shape_cast %23 : vector<8xf32> to vector<8x1xf32>
    %25 = math.log %24 : vector<8x1xf32>
    %26 = arith.addf %19, %25 : vector<8x1xf32>
    %27 = arith.mulf %10, %3 : vector<8x128xf32>
    %cst_12 = arith.constant dense<0.000000e+00> : vector<8xf32>
    %28 = vector.multi_reduction <add>, %27, %cst_12 [1] : vector<8x128xf32> to vector<8xf32>
    %29 = vector.shape_cast %28 : vector<8xf32> to vector<8x1xf32>
    %30 = arith.subf %26, %29 : vector<8x1xf32>
    %c0_13 = arith.constant 0 : index
    %c0_14 = arith.constant 0 : index
    %31 = vector.load %arg7[%c0_13, %c0_14] : memref<8x1xf32, #tpu.memory_space<vmem>>, vector<8x1xf32>
    %32 = arith.addf %31, %30 : vector<8x1xf32>
    %c0_15 = arith.constant 0 : index
    %c0_16 = arith.constant 0 : index
    %33 = vector.load %arg7[%c0_15, %c0_16] : memref<8x1xf32, #tpu.memory_space<vmem>>, vector<8x1xf32>
    tpu.vector_store %arg7[%c0_15, %c0_16], %32 {strides = array<i32>} : memref<8x1xf32, #tpu.memory_space<vmem>>, vector<8x1xf32>,
    %cst_17 = arith.constant dense<0xFF800000> : vector<8xf32>
    %34 = vector.multi_reduction <maximumf>, %4, %cst_17 [1] : vector<8x128xf32> to vector<8xf32>
    %35 = vector.shape_cast %34 : vector<8xf32> to vector<8x1xf32>
    %36 = vector.broadcast %35 : vector<8x1xf32> to vector<8x128xf32>
    %37 = arith.subf %4, %36 : vector<8x128xf32>
    %38 = math.exp %37 : vector<8x128xf32>
    %cst_18 = arith.constant dense<0.000000e+00> : vector<8xf32>
    %39 = vector.multi_reduction <add>, %38, %cst_18 [1] : vector<8x128xf32> to vector<8xf32>
    %40 = vector.shape_cast %39 : vector<8xf32> to vector<8x1xf32>
    %41 = math.log %40 : vector<8x1xf32>
    %42 = arith.addf %35, %41 : vector<8x1xf32>
    %43 = arith.mulf %10, %4 : vector<8x128xf32>
    %cst_19 = arith.constant dense<0.000000e+00> : vector<8xf32>
    %44 = vector.multi_reduction <add>, %43, %cst_19 [1] : vector<8x128xf32> to vector<8xf32>
    %45 = vector.shape_cast %44 : vector<8xf32> to vector<8x1xf32>
    %46 = arith.subf %42, %45 : vector<8x1xf32>
    %c0_20 = arith.constant 0 : index
    %c0_21 = arith.constant 0 : index
    %47 = vector.load %arg8[%c0_20, %c0_21] : memref<8x1xf32, #tpu.memory_space<vmem>>, vector<8x1xf32>
    %48 = arith.addf %47, %46 : vector<8x1xf32>
    %c0_22 = arith.constant 0 : index
    %c0_23 = arith.constant 0 : index
    %49 = vector.load %arg8[%c0_22, %c0_23] : memref<8x1xf32, #tpu.memory_space<vmem>>, vector<8x1xf32>
    tpu.vector_store %arg8[%c0_22, %c0_23], %48 {strides = array<i32>} : memref<8x1xf32, #tpu.memory_space<vmem>>, vector<8x1xf32>,
    %c0_i32_24 = arith.constant 0 : i32
    %50 = arith.cmpi eq, %arg1, %c0_i32_24 : i32
    %51 = arith.extui %50 : i1 to i32
    %c0_i32_25 = arith.constant 0 : i32
    %52 = arith.cmpi ne, %51, %c0_i32_25 : i32
    scf.if %52 {
      %53 = tpu.iota {dimensions = array<i32: 0>} : vector<8x128xi32>
      %54 = tpu.iota {dimensions = array<i32: 1>} : vector<8x128xi32>
      %cst_26 = arith.constant 0.000000e+00 : f32
      %55 = vector.broadcast %cst_26 : f32 to vector<8x128xf32>
      %c0_27 = arith.constant 0 : index
      %c0_28 = arith.constant 0 : index
      %56 = vector.load %arg6[%c0_27, %c0_28] : memref<8x1xf32, #tpu.memory_space<vmem>>, vector<8x1xf32>
      %57 = vector.shape_cast %56 : vector<8x1xf32> to vector<1x8x1xf32>
      %cst_29 = arith.constant dense<0.000000e+00> : vector<1xf32>
      %58 = vector.multi_reduction <add>, %57, %cst_29 [1, 2] : vector<1x8x1xf32> to vector<1xf32>
      %59 = vector.shape_cast %58 : vector<1xf32> to vector<1x1x1xf32>
      %60 = vector.extract %59[0, 0, 0] : f32 from vector<1x1x1xf32>
      %cst_30 = arith.constant 9.765625E-4 : f32
      %61 = arith.mulf %60, %cst_30 : f32
      %c0_i32_31 = arith.constant 0 : i32
      %62 = vector.broadcast %c0_i32_31 : i32 to vector<8x128xi32>
      %63 = arith.cmpi eq, %53, %62 : vector<8x128xi32>
      %c6_i32 = arith.constant 6 : i32
      %64 = vector.broadcast %c6_i32 : i32 to vector<8x128xi32>
      %65 = arith.cmpi eq, %54, %64 : vector<8x128xi32>
      %66 = arith.andi %63, %65 : vector<8x128xi1>
      %67 = vector.broadcast %61 : f32 to vector<8x128xf32>
      %68 = arith.select %66, %67, %55 : vector<8x128xi1>, vector<8x128xf32>
      %c0_32 = arith.constant 0 : index
      %c0_33 = arith.constant 0 : index
      %69 = vector.load %arg7[%c0_32, %c0_33] : memref<8x1xf32, #tpu.memory_space<vmem>>, vector<8x1xf32>
      %70 = vector.shape_cast %69 : vector<8x1xf32> to vector<1x8x1xf32>
      %cst_34 = arith.constant dense<0.000000e+00> : vector<1xf32>
      %71 = vector.multi_reduction <add>, %70, %cst_34 [1, 2] : vector<1x8x1xf32> to vector<1xf32>
      %72 = vector.shape_cast %71 : vector<1xf32> to vector<1x1x1xf32>
      %73 = vector.extract %72[0, 0, 0] : f32 from vector<1x1x1xf32>
      %cst_35 = arith.constant 1.250000e-01 : f32
      %74 = arith.mulf %73, %cst_35 : f32
      %c0_i32_36 = arith.constant 0 : i32
      %75 = vector.broadcast %c0_i32_36 : i32 to vector<8x128xi32>
      %76 = arith.cmpi eq, %53, %75 : vector<8x128xi32>
      %c7_i32 = arith.constant 7 : i32
      %77 = vector.broadcast %c7_i32 : i32 to vector<8x128xi32>
      %78 = arith.cmpi eq, %54, %77 : vector<8x128xi32>
      %79 = arith.andi %76, %78 : vector<8x128xi1>
      %80 = vector.broadcast %74 : f32 to vector<8x128xf32>
      %81 = arith.select %79, %80, %68 : vector<8x128xi1>, vector<8x128xf32>
      %c0_37 = arith.constant 0 : index
      %c0_38 = arith.constant 0 : index
      %82 = vector.load %arg8[%c0_37, %c0_38] : memref<8x1xf32, #tpu.memory_space<vmem>>, vector<8x1xf32>
      %83 = vector.shape_cast %82 : vector<8x1xf32> to vector<1x8x1xf32>
      %cst_39 = arith.constant dense<0.000000e+00> : vector<1xf32>
      %84 = vector.multi_reduction <add>, %83, %cst_39 [1, 2] : vector<1x8x1xf32> to vector<1xf32>
      %85 = vector.shape_cast %84 : vector<1xf32> to vector<1x1x1xf32>
      %86 = vector.extract %85[0, 0, 0] : f32 from vector<1x1x1xf32>
      %cst_40 = arith.constant 1.250000e-01 : f32
      %87 = arith.mulf %86, %cst_40 : f32
      %c0_i32_41 = arith.constant 0 : i32
      %88 = vector.broadcast %c0_i32_41 : i32 to vector<8x128xi32>
      %89 = arith.cmpi eq, %53, %88 : vector<8x128xi32>
      %c8_i32 = arith.constant 8 : i32
      %90 = vector.broadcast %c8_i32 : i32 to vector<8x128xi32>
      %91 = arith.cmpi eq, %54, %90 : vector<8x128xi32>
      %92 = arith.andi %89, %91 : vector<8x128xi1>
      %93 = vector.broadcast %87 : f32 to vector<8x128xf32>
      %94 = arith.select %92, %93, %81 : vector<8x128xi1>, vector<8x128xf32>
      %c0_42 = arith.constant 0 : index
      %c0_43 = arith.constant 0 : index
      %95 = vector.load %arg5[%c0_42, %c0_43] : memref<8x128xf32, #tpu.memory_space<vmem>>, vector<8x128xf32>
      tpu.vector_store %arg5[%c0_42, %c0_43], %94 {strides = array<i32>} : memref<8x128xf32, #tpu.memory_space<vmem>>, vector<8x128xf32>,
    } else {
    }
    return
  }
  func.func @transform_0(%arg0: i32, %arg1: i32) -> (i32, i32) {
    %c1_i32 = arith.constant 1 : i32
    %0 = arith.muli %arg0, %c1_i32 : i32
    %1 = arith.addi %0, %arg1 : i32
    %c0_i32 = arith.constant 0 : i32
    %c0_i32_0 = arith.constant 0 : i32
    return %1, %c0_i32 : i32, i32
  }
  func.func @transform_1(%arg0: i32, %arg1: i32) -> (i32, i32) {
    %c1_i32 = arith.constant 1 : i32
    %0 = arith.muli %arg0, %c1_i32 : i32
    %1 = arith.addi %0, %arg1 : i32
    %c0_i32 = arith.constant 0 : i32
    %c0_i32_0 = arith.constant 0 : i32
    return %1, %c0_i32 : i32, i32
  }
  func.func @transform_2(%arg0: i32, %arg1: i32) -> (i32, i32) {
    %c1_i32 = arith.constant 1 : i32
    %0 = arith.muli %arg0, %c1_i32 : i32
    %1 = arith.addi %0, %arg1 : i32
    %c0_i32 = arith.constant 0 : i32
    %c0_i32_0 = arith.constant 0 : i32
    return %1, %c0_i32 : i32, i32
  }
  func.func @transform_3(%arg0: i32, %arg1: i32) -> (i32, i32) {
    %c0_i32 = arith.constant 0 : i32
    %c0_i32_0 = arith.constant 0 : i32
    return %arg0, %c0_i32 : i32, i32
  }
}

</mosaic_0001>

<bundles_post_ra>
// kernel: tpu_custom_call.1
= control target key start
LH: loop header
LB: loop body
LE: loop exit
PB: predicated region body
PF: predicated region fallthrough
CT: control target
= control target key end

     0   :  { %8 = vsyncpa [#allocation6], 0  ;;  %s327_s0 = inlined_call_operand.vmem [shape: f32[8,128], index: 0, kind: input, shape index: {}]   ;;  %s328_s1 = inlined_call_operand.hbm [shape: f32[8,128], index: 1, kind: input, shape index: {}]   ;;  %s329_s2 = inlined_call_operand.vmem [shape: s32[8,1], index: 2, kind: input, shape index: {}]   ;;  %s330_s3 = inlined_call_operand.hbm [shape: f32[8,128], index: 3, kind: output, shape index: {}]  }
   0x1   :  { %9 = vsyncpa [#allocation7], 0  ;;  %s274_s12 = smov [#allocation5]  }
   0x2   :  { %s27_s13 = sshll.u32 %s274_s12, 4  ;;  %s28_s13 = int_to_ptr.vmem [resolvable:$true] %s27_s13 }
   0x3   :  { %s238_s14 = scalar_lea.vmem %s28_s13, 128  ;;  %p243_p1 = scmp.lt.s32.totalorder %s28_s13, %s28_s13 }
   0x4   :  { %p239_p0 = scmp.ne.s32.totalorder %s28_s13, %s238_s14  ;;  %p244_p2 = scmp.lt.s32.totalorder %s238_s14, %s238_s14 }
   0x6   :  { %p245_p3 = por %p244_p2, %p243_p1 }
   0x8   :  { %p246_p4 = pnand %p245_p3, %p239_p0 }
   0xa   :  { %249 = shalt.err (!%p246_p4)
}
   0xb   :  { %30 = dma.hbm_to_vmem [thread:$0]  %s328_s1, 128, %s28_s13, [#allocation6]  }
   0xc   :  { %270 = dma.done.wait [#allocation6], 128  }
   0xd   :  { %271 = vsyncadd [#allocation6], 4294967168  ;;  %v275_v0 = vmov 0   ;;  %v74_v1 = vld [vmem:[%s327_s0] sm:$0xff]  ;;  %v75_v3 = vld [vmem:[#allocation5] sm:$0xff]  ;;  %vm70_vm0 = vcmask 7168   ;;  %v77_v11 = vlaneseq }
   0xe   :  { %220 = vset.pattern.permute.xlu1 %v275_v0  ;;  %221 = vset.pattern.permute.xlu0 %v275_v0  ;;  %v76_v2 = vld [vmem:[%s329_s2] sm:$0xff]  ;;  %v276_v4 = vmov 0.0   ;;  %v85_v18 = vsub.f32 %v75_v3, %v74_v1  ;;  %s277_s23 = smov [#allocation8]  }
   0xf   :  { %93 = vmax.xlane.f32.xlu0 %v74_v1  ;;  %80 = vperm.xlu1 %220, %v76_v2   ;;  %72 = vst.msk [vmem:[#allocation3] sm:$0xff] %vm70_vm0, %v276_v4  ;;  %73 = vst.msk [vmem:[#allocation4] sm:$0xff] %vm70_vm0, %v276_v4  ;;  %v311_v12 = vand.u32 127, %v77_v11  ;;  %s188_s24 = sshll.u32 %s277_s23, 4  ;;  %s189_s24 = int_to_ptr.vmem [resolvable:$true] %s188_s24 }
  0x10   :  { %71 = vst.msk [vmem:[#allocation2] sm:$0xff] %vm70_vm0, %v276_v4  ;;  %v86_v19 = vmul.f32 %v85_v18, %v85_v18  ;;  %s250_s26 = scalar_lea.vmem %s189_s24, 128  ;;  %p255_p6 = scmp.lt.s32.totalorder %s189_s24, %s189_s24 }
  0x11   :  { %vm145_vm3 = vcmp.eq.s32.totalorder %v311_v12, 6  ;;  %vm161_vm4 = vcmp.eq.s32.totalorder %v311_v12, 7  ;;  %vm177_vm5 = vcmp.eq.s32.totalorder %v311_v12, 8  ;;  %p251_p5 = scmp.ne.s32.totalorder %s189_s24, %s250_s26  ;;  %p256_p7 = scmp.lt.s32.totalorder %s250_s26, %s250_s26 }
  0x13   :  { %110 = vmax.xlane.f32.xlu0 %v75_v3  ;;  %p257_p8 = por %p256_p7, %p255_p6 }
  0x15   :  { %p258_p9 = pnand %p257_p8, %p251_p5 }
  0x16   :  { %v107_v31 = vld [vmem:[#allocation3] sm:$0xff]  ;;  %v124_v37 = vld [vmem:[#allocation4] sm:$0xff] }
  0x17   :  { %v89_v24 = vld [vmem:[#allocation2] sm:$0xff] }
  0x8a   :  { %v81_v13 = vpop.permute.xlu1 %80 }
  0x8b   :  { %vm82_vm1 = vcmp.eq.s32.totalorder %v311_v12, %v81_v13 }
  0x8c   :  { %v209_v15 = vsel %vm82_vm1, 1.0, %v276_v4 }
  0x8d   :  { %v103_v17 = vmul.f32 %v209_v15, %v74_v1  ;;  %v120_v20 = vmul.f32 %v209_v15, %v75_v3 }
  0x98   :  { %v94_v5 = vpop.xlane.xlu0 %93 }
  0x99   :  { %v95_v6 = vsub.f32 %v74_v1, %v94_v5 }
  0x9b   :  { %v96_v7 = vmul.f32 1.442695, %v95_v6 }
  0x9c   :  { %v111_v8 = vpop.xlane.xlu0 %110 }
  0x9d   :  { %222 = vpow2.f32 %v96_v7  ;;  %v112_v9 = vsub.f32 %v75_v3, %v111_v8  ;;  %v131_v3 = vshrl.u32 %v77_v11, 7 }
  0x9f   :  { %v113_v10 = vmul.f32 1.442695, %v112_v9  ;;  %vm144_vm2 = vcmp.eq.s32.totalorder %v131_v3, 0 }
  0xa0   :  { %vm146_vm6 = vmand %vm144_vm2, %vm145_vm3 }
  0xa1   :  { %224 = vpow2.f32 %v113_v10  ;;  %vm162_vm7 = vmand %vm144_vm2, %vm161_vm4 }
  0xa2   :  { %vm178_vm8 = vmand %vm144_vm2, %vm177_vm5 }
  0xaa   :  { %v223_v14 = vpop.eup %222 }
  0xab   :  { %98 = vadd.xlane.f32.xlu1 %v223_v14 }
  0xae   :  { %v225_v16 = vpop.eup %224 }
  0xaf   :  { %115 = vadd.xlane.f32.xlu0 %v225_v16 }
  0xb3   :  { %104 = vadd.xlane.f32.xlu0 %v103_v17 }
  0xb7   :  { %87 = vadd.xlane.f32.xlu0 %v86_v19 }
  0xbb   :  { %121 = vadd.xlane.f32.xlu0 %v120_v20 }
 0x134   :  { %v99_v21 = vpop.xlane.xlu1 %98 }
 0x135   :  { %226 = vlog2.f32 %v99_v21 }
 0x138   :  { %v116_v22 = vpop.xlane.xlu0 %115 }
 0x139   :  { %228 = vlog2.f32 %v116_v22 }
 0x13c   :  { %v105_v23 = vpop.xlane.xlu0 %104 }
 0x140   :  { %v88_v25 = vpop.xlane.xlu0 %87 }
 0x141   :  { %v90_v26 = vadd.f32 %v89_v24, %v88_v25 }
 0x142   :  { %v227_v27 = vpop.eup %226 }
 0x143   :  { %v101_v28 = vmul.f32 0.6931472, %v227_v27  ;;  %92 = vst.msk [vmem:[#allocation2] sm:$0xff] %vm70_vm0, %v90_v26 }
 0x144   :  { %v122_v36 = vpop.xlane.xlu0 %121 }
 0x145   :  { %v102_v29 = vadd.f32 %v101_v28, %v94_v5 }
 0x146   :  { %v229_v30 = vpop.eup %228 }
 0x147   :  { %v118_v32 = vmul.f32 0.6931472, %v229_v30  ;;  %v106_v33 = vsub.f32 %v102_v29, %v105_v23 }
 0x149   :  { %v108_v34 = vadd.f32 %v107_v31, %v106_v33  ;;  %v119_v35 = vadd.f32 %v118_v32, %v111_v8 }
 0x14a   :  { %v132_v38 = vld [vmem:[#allocation2] sm:$0xff] }
 0x14b   :  { %109 = vst.msk [vmem:[#allocation3] sm:$0xff] %vm70_vm0, %v108_v34  ;;  %v123_v39 = vsub.f32 %v119_v35, %v122_v36  ;;  %v133_v40 = vsel %vm70_vm0, %v132_v38, 0.0 }
 0x14c   :  { %134 = vadd.xlane.f32.xlu0 %v133_v40 }
 0x14d   :  { %v125_v41 = vadd.f32 %v124_v37, %v123_v39 }
 0x14f   :  { %126 = vst.msk [vmem:[#allocation4] sm:$0xff] %vm70_vm0, %v125_v41 }
 0x152   :  { %v149_v42 = vld [vmem:[#allocation3] sm:$0xff] }
 0x153   :  { %v150_v43 = vsel %vm70_vm0, %v149_v42, 0.0 }
 0x154   :  { %151 = vadd.xlane.f32.xlu0 %v150_v43 }
 0x156   :  { %v165_v44 = vld [vmem:[#allocation4] sm:$0xff] }
 0x157   :  { %v166_v45 = vsel %vm70_vm0, %v165_v44, 0.0 }
 0x158   :  { %167 = vadd.xlane.f32.xlu0 %v166_v45 }
 0x1d5   :  { %v135_v46 = vpop.xlane.xlu0 %134 }
 0x1d6   :  { %v136_v47 = vrot.slane %v135_v46, 4 }
 0x1d8   :  { %v137_v48 = vadd.f32 %v136_v47, %v135_v46 }
 0x1da   :  { %v138_v49 = vrot.slane %v137_v48, 2 }
 0x1dc   :  { %v139_v50 = vadd.f32 %v138_v49, %v137_v48 }
 0x1dd   :  { %v152_v51 = vpop.xlane.xlu0 %151 }
 0x1de   :  { %v153_v52 = vrot.slane %v152_v51, 4  ;;  %v140_v53 = vrot.slane %v139_v50, 1 }
 0x1e0   :  { %v154_v54 = vadd.f32 %v153_v52, %v152_v51  ;;  %v141_v55 = vadd.f32 %v140_v53, %v139_v50 }
 0x1e1   :  { %v168_v56 = vpop.xlane.xlu0 %167 }
 0x1e2   :  { %v155_v57 = vrot.slane %v154_v54, 2  ;;  %v169_v58 = vrot.slane %v168_v56, 4  ;;  %210 = vpush %v141_v55 }
 0x1e4   :  { %v170_v59 = vadd.f32 %v169_v58, %v168_v56  ;;  %v156_v60 = vadd.f32 %v155_v57, %v154_v54 }
 0x1e6   :  { %v171_v61 = vrot.slane %v170_v59, 2  ;;  %v157_v62 = vrot.slane %v156_v60, 1 }
 0x1e8   :  { %v172_v63 = vadd.f32 %v171_v61, %v170_v59  ;;  %v158_v0 = vadd.f32 %v157_v62, %v156_v60 }
 0x1ea   :  { %212 = vpush %v158_v0  ;;  %v173_v1 = vrot.slane %v172_v63, 1 }
 0x1ec   :  { %v174_v2 = vadd.f32 %v173_v1, %v172_v63 }
 0x1ee   :  { %214 = vpush %v174_v2 }
 0x213   :  { %s211_s0 = spop %210 }
 0x214   :  { %s143_s1 = smul.f32 0.0009765625, %s211_s0 }
 0x216   :  { %v147_v4 = vstv %s143_s1 }
 0x217   :  { %v148_v6 = vsel %vm146_vm6, %v147_v4, 0.0 }
 0x21b   :  { %s213_s2 = spop %212 }
 0x21c   :  { %s160_s21 = smul.f32 0.125, %s213_s2 }
 0x21e   :  { %v163_v5 = vstv %s160_s21 }
 0x21f   :  { %s215_s22 = spop %214  ;;  %v164_v7 = vsel %vm162_vm7, %v163_v5, %v148_v6 }
 0x220   :  { %s176_s25 = smul.f32 0.125, %s215_s22 }
 0x222   :  { %v179_v8 = vstv %s176_s25 }
 0x223   :  { %v180_v9 = vsel %vm178_vm8, %v179_v8, %v164_v7 }
 0x224   :  { %181 = vst [vmem:[#allocation8] sm:$0xff] %v180_v9 }
 0x225   :  { %261 = shalt.err (!%p258_p9)
}
 0x226   :  { %191 = dma.vmem_to_hbm [thread:$0]  %s189_s24, 128, %s330_s3, [#allocation7]  }
 0x227   :  { %272 = dma.done.wait [#allocation7], 128  }
 0x228   :  { %273 = vsyncadd [#allocation7], 4294967168 }
 0x229   :  { %195 = vsyncpa [#allocation6], 1 }
 0x22a   :  { %196 = vsyncpa [#allocation7], 1 }

</bundles_post_ra>
